<compile_context>
chip_gen: v5e
topology: v5e:2x2
jax: 0.10.0
libtpu: 0.0.40
codegen_flags: <defaults>
</compile_context>

<pallas_src>
import jax
import jax.numpy as jnp
from jax import lax
from jax.experimental import pallas as pl
from jax.experimental.pallas import tpu as pltpu


def _corr_kernel(a_ref, b_ref, o_ref):
    # a_ref: (1, C, TM) lane-dense along k;  b_ref: (1, C, TN) lane-dense along m
    # o_ref: (1, TM, TN);  out[k, m] = sum_c A[c, k] * B[c, m]
    a = a_ref[0]      # (C, TM)
    bm = b_ref[0]     # (C, TN)
    acc = lax.dot_general(
        a, bm,
        dimension_numbers=(((0,), (0,)), ((), ())),   # contract over c
        preferred_element_type=jnp.float32)
    o_ref[0] = acc.astype(o_ref.dtype)


def _pick_tile(n, target, align):
    """Largest multiple of `align` that divides n and is <= target; else n (full dim)."""
    if n % align != 0:
        return n
    t = min(target, n)
    t -= t % align
    while t >= align and n % t != 0:
        t -= align
    return t if t >= align else n


def feature_correlation(feature_A, feature_B, *, block_m=512, block_n=512):
    """Pallas implementation of FeatureCorrelation.forward (inputs NCHW)."""
    b, c, h, w = feature_A.shape
    hw = h * w
    itemsize = jnp.dtype(feature_A.dtype).itemsize

    # A.transpose(2,3).view(b, c, h*w): k = w_idx*h + h_idx  (lane-dense along k)
    a_mat = jnp.transpose(feature_A, (0, 1, 3, 2)).reshape(b, c, hw)
    # B.view(b, c, h*w): m = h_idx*w + w_idx  (lane-dense along m, pure reshape)
    b_mat = feature_B.reshape(b, c, hw)

    tm = _pick_tile(hw, block_m, 8)     # output rows  (sublane) tile
    tn = _pick_tile(hw, block_n, 128)   # output lanes tile (unmasked vst)
    grid = (b, hw // tm, hw // tn)

    # Rough double-buffered VMEM footprint (f32 upper bound on the out tile).
    est_vmem = 2 * (tm * tn * 4 + c * (tm + tn) * itemsize)
    compiler_kwargs = dict(
        dimension_semantics=("parallel", "parallel", "parallel"))
    if est_vmem > 12 * 1024 * 1024:
        # Only hit when an awkward hw forces a full-dim block: relax the
        # 16/32 MiB default scoped limit while staying under v7x's 64 MiB VMEM.
        compiler_kwargs["vmem_limit_bytes"] = 48 * 1024 * 1024

    cost = pl.CostEstimate(
        flops=2 * b * hw * hw * c,
        transcendentals=0,
        bytes_accessed=(b * hw * hw + 2 * b * c * hw) * itemsize)

    out = pl.pallas_call(
        _corr_kernel,
        out_shape=jax.ShapeDtypeStruct((b, hw, hw), feature_A.dtype),
        grid=grid,
        in_specs=[
            # A tile is independent of j -> stays resident across the inner axis.
            pl.BlockSpec((1, c, tm), lambda bi, i, j: (bi, 0, i)),
            pl.BlockSpec((1, c, tn), lambda bi, i, j: (bi, 0, j)),
        ],
        out_specs=pl.BlockSpec((1, tm, tn), lambda bi, i, j: (bi, i, j)),
        compiler_params=pltpu.CompilerParams(**compiler_kwargs),
        cost_estimate=cost,
    )(a_mat, b_mat)

    # (b, hw, hw) -> (b, hw, h, w): matches
    # view(b,h,w,h*w).transpose(2,3).transpose(1,2) in the PyTorch reference.
    return out.reshape(b, hw, h, w)


def _reference(feature_A, feature_B):
    """Pure JAX reference reproducing the PyTorch semantics exactly."""
    b, c, h, w = feature_A.shape
    fa = jnp.transpose(feature_A, (0, 1, 3, 2)).reshape(b, c, h * w)
    fb = jnp.transpose(feature_B.reshape(b, c, h * w), (0, 2, 1))
    mul = jnp.einsum("bmc,bck->bmk", fb, fa)
    corr = mul.reshape(b, h, w, h * w)
    corr = jnp.transpose(corr, (0, 1, 3, 2))
    corr = jnp.transpose(corr, (0, 2, 1, 3))
    return corr


if __name__ == "__main__":
    key = jax.random.PRNGKey(0)
    ka, kb = jax.random.split(key)
    b, c, h, w = 2, 4, 16, 16
    feature_A = jax.random.normal(ka, (b, c, h, w), dtype=jnp.float32)
    feature_B = jax.random.normal(kb, (b, c, h, w), dtype=jnp.float32)

    out = feature_correlation(feature_A, feature_B)
    out = jax.block_until_ready(out)

    ref = jax.block_until_ready(_reference(feature_A, feature_B))
    assert out.shape == (b, h * w, h, w), out.shape
    assert jnp.allclose(out, ref, atol=1e-5, rtol=1e-5), "mismatch vs reference"

    print("KERNEL_OK")
</pallas_src>

<mosaic_0001>
module attributes {stable_mosaic.version = 11 : i64} {
  func.func @_corr_kernel(%arg0: i32, %arg1: i32, %arg2: i32, %arg3: memref<1x4x256xf32, #tpu.memory_space<vmem>>, %arg4: memref<1x4x256xf32, #tpu.memory_space<vmem>>, %arg5: memref<1x256x256xf32, #tpu.memory_space<vmem>>) attributes {dimension_semantics = [#tpu.dimension_semantics<parallel>, #tpu.dimension_semantics<parallel>, #tpu.dimension_semantics<parallel>], iteration_bounds = array<i64: 2, 1, 1>, scalar_prefetch = 0 : i64, scratch_operands = 0 : i64, tpu.core_type = #tpu.core_type<tc>, window_params = [{transform_indices = @transform_0, window_bounds = array<i64: 1, 4, 256>}, {transform_indices = @transform_1, window_bounds = array<i64: 1, 4, 256>}, {transform_indices = @transform_2, window_bounds = array<i64: 1, 256, 256>}]} {
    %c0 = arith.constant 0 : index
    %c0_0 = arith.constant 0 : index
    %c0_1 = arith.constant 0 : index
    %0 = vector.load %arg3[%c0, %c0_0, %c0_1] : memref<1x4x256xf32, #tpu.memory_space<vmem>>, vector<1x4x256xf32>
    %1 = vector.shape_cast %0 : vector<1x4x256xf32> to vector<4x256xf32>
    %c0_2 = arith.constant 0 : index
    %c0_3 = arith.constant 0 : index
    %c0_4 = arith.constant 0 : index
    %2 = vector.load %arg4[%c0_2, %c0_3, %c0_4] : memref<1x4x256xf32, #tpu.memory_space<vmem>>, vector<1x4x256xf32>
    %3 = vector.shape_cast %2 : vector<1x4x256xf32> to vector<4x256xf32>
    %cst = arith.constant dense<0.000000e+00> : vector<256x256xf32>
    %4 = tpu.matmul %1, %3, %cst {dimension_numbers = #tpu.dot_dimension_numbers<[0], [0], [1], [1], [0, 1, 1, 1], [], []>} : vector<4x256xf32>, vector<4x256xf32>, vector<256x256xf32> -> vector<256x256xf32>
    %c0_5 = arith.constant 0 : index
    %c0_6 = arith.constant 0 : index
    %c0_7 = arith.constant 0 : index
    %5 = vector.load %arg5[%c0_5, %c0_6, %c0_7] : memref<1x256x256xf32, #tpu.memory_space<vmem>>, vector<1x256x256xf32>
    %6 = vector.shape_cast %5 : vector<1x256x256xf32> to vector<256x256xf32>
    %7 = vector.shape_cast %4 : vector<256x256xf32> to vector<1x256x256xf32>
    tpu.vector_store %arg5[%c0_5, %c0_6, %c0_7], %7 {strides = array<i32>} : memref<1x256x256xf32, #tpu.memory_space<vmem>>, vector<1x256x256xf32>,
    return
  }
  func.func @transform_0(%arg0: i32, %arg1: i32, %arg2: i32) -> (i32, i32, i32) {
    %c0_i32 = arith.constant 0 : i32
    %c0_i32_0 = arith.constant 0 : i32
    return %arg0, %c0_i32, %arg1 : i32, i32, i32
  }
  func.func @transform_1(%arg0: i32, %arg1: i32, %arg2: i32) -> (i32, i32, i32) {
    %c0_i32 = arith.constant 0 : i32
    %c0_i32_0 = arith.constant 0 : i32
    return %arg0, %c0_i32, %arg2 : i32, i32, i32
  }
  func.func @transform_2(%arg0: i32, %arg1: i32, %arg2: i32) -> (i32, i32, i32) {
    %c0_i32 = arith.constant 0 : i32
    return %arg0, %arg1, %arg2 : i32, i32, i32
  }
}

</mosaic_0001>

<bundles_post_ra>
// kernel: tpu_custom_call.1
= control target key start
LH: loop header
LB: loop body
LE: loop exit
PB: predicated region body
PF: predicated region fallthrough
CT: control target
= control target key end

     0   :  { %7 = vsyncpa [#allocation3], 0  ;;  %s1429_s0 = inlined_call_operand.hbm [shape: f32[2,4,256], index: 0, kind: input, shape index: {}]   ;;  %s1430_s1 = inlined_call_operand.hbm [shape: f32[2,4,256], index: 1, kind: input, shape index: {}]   ;;  %s1431_s2 = inlined_call_operand.hbm [shape: f32[2,256,256], index: 2, kind: output, shape index: {}]  }
   0x1   :  { %9 = vsyncpa [#allocation3 + $0x1], 0 }
   0x2   :  { %10 = vsyncpa [#allocation6], 0 }
   0x3   :  { %12 = vsyncpa [#allocation6 + $0x1], 0 }
   0x4   :  { %13 = vsyncpa [#allocation4], 0 }
   0x5   :  { %15 = vsyncpa [#allocation4 + $0x1], 0  ;;  %s1169_s9 = smov 0   ;;  %s1171_s10 = smov 0  }
   0x6   :  { %s1173_s11 = smov 0   ;;  %s1175_s12 = smov 0  }
   0x7   :  { %s1177_s13 = smov 0   ;;  %s1179_s14 = smov 0  }
   0x8 LB: > { %s844_s15 = sadd.s32 4294967295, %s1150_s14   ;;  %s845_s16 = sadd.s32 4294967294, %s1150_s14   ;;  %s1150_s14 = sphi %s1179_s14, %s21_s14   ;;  %s1146_s13 = sphi %s1177_s13, %s1440_s13   ;;  %s1142_s12 = sphi %s1175_s12, %s1439_s12   ;;  %s1138_s11 = sphi %s1173_s11, %s1438_s11   ;;  %s1134_s10 = sphi %s1171_s10, %s1437_s10   ;;  %s1130_s9 = sphi %s1169_s9, %s1436_s9  }
   0x9   : > { %s40_s17 = sadd.s32 1, %s1146_s13  ;;  %s49_s18 = sadd.s32 1, %s1138_s11 }
   0xa   : > { %p42_p0 = scmp.ge.s32.totalorder %s40_s17, 2  ;;  %p56_p1 = scmp.ne.s32.totalorder %s1138_s11, %s1134_s10 }
   0xb   : > { %p57_p2 = scmp.eq.s32.totalorder %s1150_s14, 0  ;;  %p62_p3 = scmp.ne.s32.totalorder %s1134_s10, %s1130_s9 }
   0xc   : > { %s1442_s17 = smov (%p42_p0, %s40_s17), 0  ;;  %p63_p5 = scmp.eq.s32.totalorder %s844_s15, 0 }
   0xd   : > { %p1210_p4 = por %p57_p2, %p56_p1  ;;  %s44_s20 = ssub.s32 %s1146_s13, %s1442_s17 }
   0xe   : > { %p118_p6 = scmp.eq.s32.totalorder %s844_s15, 1  ;;  %p47_p7 = scmp.eq.s32.totalorder %s44_s20, 0 }
   0xf   : > { %p1216_p8 = por %p63_p5, %p62_p3  ;;  %p124_p10 = scmp.eq.s32.totalorder %s845_s16, 1 }
  0x10   : > { %p1220_p9 = por %p118_p6, %p56_p1  ;;  %p847_p12 = scmp.ge.s32.totalorder %s1150_s14, 2 }
  0x11   : > { %s1225_s23 = scalar_select %p47_p7, %s1138_s11, %s49_s18  }
  0x12   : > { %p1227_p11 = por %p124_p10, %p62_p3  ;;  %p951_p13 = scmp.lt.s32.totalorder %s1150_s14, 2 }
  0x13   : > { %s144_s25 = sand.u32 1, %s1138_s11   ;;  %s929_s27 = sshll.u32 %s1146_s13, 3 }
  0x14   : > { %s848_s26 = sshll.u32 %s144_s25, 3  ;;  %s155_s30 = scalar_lea.hbm %s1429_s0, %s929_s27 }
  0x15   : > { %s148_s3 = scalar_lea.vmem [#allocation2], %s848_s26  ;;  %s157_s5 = sshll.u32 %s155_s30, 4  ;;  %s158_s5 = int_to_ptr.hbm [resolvable:$true] %s157_s5 }
  0x16   : > { %s159_s4 = sshll.u32 %s148_s3, 4  ;;  %p941_p0 = pnand %p951_p13, %p1210_p4  ;;  %s160_s4 = int_to_ptr.vmem [resolvable:$true] %s159_s4 }
  0x17   : > { %p854_p1 = scmp.ge.s32.totalorder %s1150_s14, 1  ;;  %p186_p2 = scmp.lt.s32.totalorder %s1150_s14, 3 }
  0x18   : > { %s145_s6 = scalar_lea.sflag [#allocation3], %s144_s25  ;;  %s177_s15 = scalar_lea.hbm %s1430_s1, %s929_s27 }
  0x19   : > { %943 = dma.hbm_to_vmem [thread:$0]  (!%p941_p0), %s158_s5, 128, %s160_s4, %s145_s6  }
  0x1a   : > { %p187_p3 = pnand %p854_p1, %p186_p2  ;;  %s170_s16 = scalar_lea.vmem [#allocation5], %s848_s26 }
  0x1b   : > { %s181_s18 = sshll.u32 %s170_s16, 4  ;;  %s179_s20 = sshll.u32 %s177_s15, 4  ;;  %s182_s18 = int_to_ptr.vmem [resolvable:$true] %s181_s18  ;;  %s180_s20 = int_to_ptr.hbm [resolvable:$true] %s179_s20 }
  0x1c   : > { %s167_s28 = scalar_lea.sflag [#allocation6], %s144_s25  ;;  %190 = sbr.rel (%p187_p3) target bundleno = 589 (0x24d), region = 28 }
  0x1d   : > { %946 = dma.hbm_to_vmem [thread:$0]  (!%p941_p0), %s180_s20, 128, %s182_s18, %s167_s28  }
  0x1e   : > { %s1246_s19 = sand.u32 (!%p187_p3), 1, %s1134_s10  }
  0x1f   : > { %s855_s29 = sshll.u32 (!%p187_p3), %s1246_s19, 3  ;;  %s193_s30 = scalar_lea.sflag (!%p187_p3), [#allocation3], %s1246_s19 }
  0x20   : > { %s196_s3 = scalar_lea.vmem (!%p187_p3), [#allocation2], %s855_s29 }
  0x21   : > { %1117 = dma.done.wait (%p1216_p8), %s193_s30, 128  }
  0x22   : > { %1119 = vsyncadd (%p1216_p8), %s193_s30, 4294967168  ;;  %s203_s26 = scalar_lea.sflag [#allocation6], %s1246_s19  ;;  %s206_s25 = scalar_lea.vmem [#allocation5], %s855_s29 }
  0x23   : > { %1121 = dma.done.wait (%p1216_p8), %s203_s26, 128  }
  0x24   : > { %1123 = vsyncadd (%p1216_p8), %s203_s26, 4294967168  ;;  %v237_v0 = vld [vmem:[%s196_s3] sm:$0xff]  ;;  %v238_v1 = vld [vmem:[%s206_s25] sm:$0xff]  ;;  %vm410_vm0 = vcmask 1043456   ;;  %vm313_vm1 = vcmask 31744   ;;  %s857_s21 = sshll.u32 %s1246_s19, 9 }
  0x25   : > { %240 = vst [vmem:[#allocation1] ss:$2 sm:$0xff] %v237_v0  ;;  %s1294_s27 = scalar_lea.vmem [#allocation7], %s857_s21  ;;  %s931_s4 = sshll.u32 %s1142_s12, 9 }
  0x26   : > { %s722_s7 = scalar_lea.hbm %s1431_s2, %s931_s4  ;;  %s723_s8 = sshll.u32 %s1294_s27, 4  ;;  %s724_s8 = int_to_ptr.vmem [resolvable:$true] %s723_s8 }
  0x27   : > { %s725_s15 = sshll.u32 %s722_s7, 4  ;;  %s706_s16 = scalar_lea.sflag [#allocation4], %s1246_s19  ;;  %s726_s15 = int_to_ptr.hbm [resolvable:$true] %s725_s15 }
  0x28   : > { %s1078_s18 = sshra.s32 %s726_s15, 4  ;;  %s1084_s29 = scalar_lea.hbm %s1431_s2, 1024  ;;  %s1079_s18 = int_to_ptr.hbm [resolvable:$true] %s1078_s18 }
  0x29   : > { %s1080_s12 = scalar_lea.hbm %s1079_s18, 512  ;;  %p1085_p7 = scmp.lt.s32.totalorder %s1079_s18, %s1431_s2 }
  0x2a   : > { %p1081_p4 = scmp.ne.s32.totalorder %s1079_s18, %s1080_s12  ;;  %p1086_p8 = scmp.lt.s32.totalorder %s1084_s29, %s1080_s12 }
  0x2c   : > { %v242_v2 = vld.sshfl [vmem:[#allocation1 + $0x8] sm:$0xff pattern:$0x75316420]  ;;  %v241_v3 = vld.sshfl [vmem:[#allocation1] sm:$0xff pattern:$0x75316420]  ;;  %p1082_p5 = pnand %p1081_p4, %p1220_p9  ;;  %p1087_p10 = por %p1086_p8, %p1085_p7 }
  0x2d   : > { %277 = vxpose.xlu0.b32.start.end [1/1] (short) %v242_v2, 128  ;;  %310 = vst [vmem:[#allocation1] ss:$2 sm:$0xff] %v238_v1 }
  0x2e   : > { %p1083_p6 = pneg %p1082_p5 }
  0x30   : > { %p1088_p13 = pnand %p1087_p10, %p1083_p6 }
  0x34   : > { %v311_v4 = vld.sshfl [vmem:[#allocation1] sm:$0xff pattern:$0x75316420]  ;;  %v312_v5 = vld.sshfl [vmem:[#allocation1 + $0x8] sm:$0xff pattern:$0x75316420] }
  0x35   : > { %932 = vmatpush.msk.msra.mxu2 %vm410_vm0, %v311_v4  ;;  %858 = vmatpush.msk.msra.mxu0 %vm410_vm0, %v311_v4 }
  0x36   : > { %933 = vmatpush.msk.msra.mxu3 %vm410_vm0, %v312_v5  ;;  %891 = vmatpush.msk.msra.mxu1 %vm410_vm0, %v312_v5 }
  0xad   : > { %245 = vxpose.xlu0.b32.start.end [1/1] (short) %v241_v3, 128 }
  0xd1   : > { %v293_v6 = vpop.trf.xlu0 }
  0xd2   : > { %875 = vmatmul.msk.f32.vlgmr.msra.gmra.mxu2 %vm313_vm1, %v293_v6  ;;  %908 = vmatmul.msk.f32.vlgmr.msra.gmra.mxu3 %vm313_vm1, %v293_v6 }
  0xd9   : > { %v294_v7 = vpop.trf.xlu0 }
  0xda   : > { %876 = vmatmul.msk.f32.gmra.mxu2 %vm313_vm1, %v294_v7  ;;  %909 = vmatmul.msk.f32.gmra.mxu3 %vm313_vm1, %v294_v7 }
  0xe1   : > { %v295_v8 = vpop.trf.xlu0 }
  0xe2   : > { %877 = vmatmul.msk.f32.gmra.mxu2 %vm313_vm1, %v295_v8  ;;  %910 = vmatmul.msk.f32.gmra.mxu3 %vm313_vm1, %v295_v8 }
  0xe9   : > { %v296_v9 = vpop.trf.xlu0 }
  0xea   : > { %878 = vmatmul.msk.f32.gmra.mxu2 %vm313_vm1, %v296_v9  ;;  %911 = vmatmul.msk.f32.gmra.mxu3 %vm313_vm1, %v296_v9 }
  0xf1   : > { %v297_v10 = vpop.trf.xlu0 }
  0xf2   : > { %879 = vmatmul.msk.f32.gmra.mxu2 %vm313_vm1, %v297_v10  ;;  %912 = vmatmul.msk.f32.gmra.mxu3 %vm313_vm1, %v297_v10 }
  0xf9   : > { %v298_v11 = vpop.trf.xlu0 }
  0xfa   : > { %880 = vmatmul.msk.f32.gmra.mxu2 %vm313_vm1, %v298_v11  ;;  %913 = vmatmul.msk.f32.gmra.mxu3 %vm313_vm1, %v298_v11 }
 0x101   : > { %v299_v12 = vpop.trf.xlu0 }
 0x102   : > { %881 = vmatmul.msk.f32.gmra.mxu2 %vm313_vm1, %v299_v12  ;;  %914 = vmatmul.msk.f32.gmra.mxu3 %vm313_vm1, %v299_v12 }
 0x109   : > { %v300_v13 = vpop.trf.xlu0 }
 0x10a   : > { %882 = vmatmul.msk.f32.gmra.mxu2 %vm313_vm1, %v300_v13  ;;  %915 = vmatmul.msk.f32.gmra.mxu3 %vm313_vm1, %v300_v13 }
 0x111   : > { %v301_v14 = vpop.trf.xlu0 }
 0x112   : > { %883 = vmatmul.msk.f32.gmra.mxu2 %vm313_vm1, %v301_v14  ;;  %916 = vmatmul.msk.f32.gmra.mxu3 %vm313_vm1, %v301_v14 }
 0x119   : > { %v302_v15 = vpop.trf.xlu0 }
 0x11a   : > { %884 = vmatmul.msk.f32.gmra.mxu2 %vm313_vm1, %v302_v15  ;;  %917 = vmatmul.msk.f32.gmra.mxu3 %vm313_vm1, %v302_v15 }
 0x121   : > { %v303_v16 = vpop.trf.xlu0 }
 0x122   : > { %885 = vmatmul.msk.f32.gmra.mxu2 %vm313_vm1, %v303_v16  ;;  %918 = vmatmul.msk.f32.gmra.mxu3 %vm313_vm1, %v303_v16 }
 0x129   : > { %v304_v17 = vpop.trf.xlu0 }
 0x12a   : > { %886 = vmatmul.msk.f32.gmra.mxu2 %vm313_vm1, %v304_v17  ;;  %919 = vmatmul.msk.f32.gmra.mxu3 %vm313_vm1, %v304_v17 }
 0x131   : > { %v305_v18 = vpop.trf.xlu0 }
 0x132   : > { %887 = vmatmul.msk.f32.gmra.mxu2 %vm313_vm1, %v305_v18  ;;  %920 = vmatmul.msk.f32.gmra.mxu3 %vm313_vm1, %v305_v18 }
 0x139   : > { %v306_v19 = vpop.trf.xlu0 }
 0x13a   : > { %888 = vmatmul.msk.f32.gmra.mxu2 %vm313_vm1, %v306_v19  ;;  %921 = vmatmul.msk.f32.gmra.mxu3 %vm313_vm1, %v306_v19 }
 0x141   : > { %v307_v20 = vpop.trf.xlu0 }
 0x142   : > { %889 = vmatmul.msk.f32.gmra.mxu2 %vm313_vm1, %v307_v20  ;;  %922 = vmatmul.msk.f32.gmra.mxu3 %vm313_vm1, %v307_v20 }
 0x149   : > { %v308_v21 = vpop.trf.xlu0 }
 0x14a   : > { %890 = vmatmul.msk.f32.gmra.mxu2 %vm313_vm1, %v308_v21  ;;  %923 = vmatmul.msk.f32.gmra.mxu3 %vm313_vm1, %v308_v21 }
 0x151   : > { %v261_v22 = vpop.trf.xlu0 }
 0x152   : > { %859 = vmatmul.msk.f32.vlgmr.msra.gmra.mxu0 %vm313_vm1, %v261_v22  ;;  %892 = vmatmul.msk.f32.vlgmr.msra.gmra.mxu1 %vm313_vm1, %v261_v22 }
 0x155   : > { %v480_v23 = vpop.f32.mrf.mxu2  ;;  %v593_v24 = vpop.f32.mrf.mxu3 }
 0x156   : > { %673 = vst [vmem:[%s1294_s27 + $0x100] sm:$0xff] %v480_v23 }
 0x157   : > { %674 = vst [vmem:[%s1294_s27 + $0x108] sm:$0xff] %v593_v24 }
 0x159   : > { %v262_v25 = vpop.trf.xlu0 }
 0x15a   : > { %860 = vmatmul.msk.f32.gmra.mxu0 %vm313_vm1, %v262_v25  ;;  %893 = vmatmul.msk.f32.gmra.mxu1 %vm313_vm1, %v262_v25 }
 0x15d   : > { %v483_v26 = vpop.f32.mrf.mxu2  ;;  %v596_v27 = vpop.f32.mrf.mxu3 }
 0x15e   : > { %675 = vst [vmem:[%s1294_s27 + $0x110] sm:$0xff] %v483_v26 }
 0x15f   : > { %676 = vst [vmem:[%s1294_s27 + $0x118] sm:$0xff] %v596_v27 }
 0x161   : > { %v263_v28 = vpop.trf.xlu0 }
 0x162   : > { %861 = vmatmul.msk.f32.gmra.mxu0 %vm313_vm1, %v263_v28  ;;  %894 = vmatmul.msk.f32.gmra.mxu1 %vm313_vm1, %v263_v28 }
 0x165   : > { %v486_v29 = vpop.f32.mrf.mxu2  ;;  %v599_v30 = vpop.f32.mrf.mxu3 }
 0x166   : > { %677 = vst [vmem:[%s1294_s27 + $0x120] sm:$0xff] %v486_v29 }
 0x167   : > { %678 = vst [vmem:[%s1294_s27 + $0x128] sm:$0xff] %v599_v30 }
 0x169   : > { %v264_v31 = vpop.trf.xlu0 }
 0x16a   : > { %862 = vmatmul.msk.f32.gmra.mxu0 %vm313_vm1, %v264_v31  ;;  %895 = vmatmul.msk.f32.gmra.mxu1 %vm313_vm1, %v264_v31 }
 0x16d   : > { %v489_v32 = vpop.f32.mrf.mxu2  ;;  %v602_v33 = vpop.f32.mrf.mxu3 }
 0x16e   : > { %679 = vst [vmem:[%s1294_s27 + $0x130] sm:$0xff] %v489_v32 }
 0x16f   : > { %680 = vst [vmem:[%s1294_s27 + $0x138] sm:$0xff] %v602_v33 }
 0x171   : > { %v265_v34 = vpop.trf.xlu0 }
 0x172   : > { %863 = vmatmul.msk.f32.gmra.mxu0 %vm313_vm1, %v265_v34  ;;  %896 = vmatmul.msk.f32.gmra.mxu1 %vm313_vm1, %v265_v34 }
 0x175   : > { %v492_v35 = vpop.f32.mrf.mxu2  ;;  %v605_v36 = vpop.f32.mrf.mxu3 }
 0x176   : > { %681 = vst [vmem:[%s1294_s27 + $0x140] sm:$0xff] %v492_v35 }
 0x177   : > { %682 = vst [vmem:[%s1294_s27 + $0x148] sm:$0xff] %v605_v36 }
 0x179   : > { %v266_v37 = vpop.trf.xlu0 }
 0x17a   : > { %864 = vmatmul.msk.f32.gmra.mxu0 %vm313_vm1, %v266_v37  ;;  %897 = vmatmul.msk.f32.gmra.mxu1 %vm313_vm1, %v266_v37 }
 0x17d   : > { %v495_v38 = vpop.f32.mrf.mxu2  ;;  %v608_v39 = vpop.f32.mrf.mxu3 }
 0x17e   : > { %683 = vst [vmem:[%s1294_s27 + $0x150] sm:$0xff] %v495_v38 }
 0x17f   : > { %684 = vst [vmem:[%s1294_s27 + $0x158] sm:$0xff] %v608_v39 }
 0x181   : > { %v267_v40 = vpop.trf.xlu0 }
 0x182   : > { %865 = vmatmul.msk.f32.gmra.mxu0 %vm313_vm1, %v267_v40  ;;  %898 = vmatmul.msk.f32.gmra.mxu1 %vm313_vm1, %v267_v40 }
 0x185   : > { %v498_v41 = vpop.f32.mrf.mxu2  ;;  %v611_v42 = vpop.f32.mrf.mxu3 }
 0x186   : > { %685 = vst [vmem:[%s1294_s27 + $0x160] sm:$0xff] %v498_v41 }
 0x187   : > { %686 = vst [vmem:[%s1294_s27 + $0x168] sm:$0xff] %v611_v42 }
 0x189   : > { %v268_v43 = vpop.trf.xlu0 }
 0x18a   : > { %866 = vmatmul.msk.f32.gmra.mxu0 %vm313_vm1, %v268_v43  ;;  %899 = vmatmul.msk.f32.gmra.mxu1 %vm313_vm1, %v268_v43 }
 0x18d   : > { %v501_v44 = vpop.f32.mrf.mxu2  ;;  %v614_v45 = vpop.f32.mrf.mxu3 }
 0x18e   : > { %687 = vst [vmem:[%s1294_s27 + $0x170] sm:$0xff] %v501_v44 }
 0x18f   : > { %688 = vst [vmem:[%s1294_s27 + $0x178] sm:$0xff] %v614_v45 }
 0x191   : > { %v269_v46 = vpop.trf.xlu0 }
 0x192   : > { %867 = vmatmul.msk.f32.gmra.mxu0 %vm313_vm1, %v269_v46  ;;  %900 = vmatmul.msk.f32.gmra.mxu1 %vm313_vm1, %v269_v46 }
 0x195   : > { %v504_v47 = vpop.f32.mrf.mxu2  ;;  %v617_v48 = vpop.f32.mrf.mxu3 }
 0x196   : > { %689 = vst [vmem:[%s1294_s27 + $0x180] sm:$0xff] %v504_v47 }
 0x197   : > { %690 = vst [vmem:[%s1294_s27 + $0x188] sm:$0xff] %v617_v48 }
 0x199   : > { %v270_v49 = vpop.trf.xlu0 }
 0x19a   : > { %868 = vmatmul.msk.f32.gmra.mxu0 %vm313_vm1, %v270_v49  ;;  %901 = vmatmul.msk.f32.gmra.mxu1 %vm313_vm1, %v270_v49 }
 0x19d   : > { %v507_v50 = vpop.f32.mrf.mxu2  ;;  %v620_v51 = vpop.f32.mrf.mxu3 }
 0x19e   : > { %691 = vst [vmem:[%s1294_s27 + $0x190] sm:$0xff] %v507_v50 }
 0x19f   : > { %692 = vst [vmem:[%s1294_s27 + $0x198] sm:$0xff] %v620_v51 }
 0x1a1   : > { %v271_v52 = vpop.trf.xlu0 }
 0x1a2   : > { %869 = vmatmul.msk.f32.gmra.mxu0 %vm313_vm1, %v271_v52  ;;  %902 = vmatmul.msk.f32.gmra.mxu1 %vm313_vm1, %v271_v52 }
 0x1a5   : > { %v510_v53 = vpop.f32.mrf.mxu2  ;;  %v623_v54 = vpop.f32.mrf.mxu3 }
 0x1a6   : > { %693 = vst [vmem:[%s1294_s27 + $0x1a0] sm:$0xff] %v510_v53 }
 0x1a7   : > { %694 = vst [vmem:[%s1294_s27 + $0x1a8] sm:$0xff] %v623_v54 }
 0x1a9   : > { %v272_v55 = vpop.trf.xlu0 }
 0x1aa   : > { %870 = vmatmul.msk.f32.gmra.mxu0 %vm313_vm1, %v272_v55  ;;  %903 = vmatmul.msk.f32.gmra.mxu1 %vm313_vm1, %v272_v55 }
 0x1ad   : > { %v513_v56 = vpop.f32.mrf.mxu2  ;;  %v626_v57 = vpop.f32.mrf.mxu3 }
 0x1ae   : > { %695 = vst [vmem:[%s1294_s27 + $0x1b0] sm:$0xff] %v513_v56 }
 0x1af   : > { %696 = vst [vmem:[%s1294_s27 + $0x1b8] sm:$0xff] %v626_v57 }
 0x1b1   : > { %v273_v58 = vpop.trf.xlu0 }
 0x1b2   : > { %871 = vmatmul.msk.f32.gmra.mxu0 %vm313_vm1, %v273_v58  ;;  %904 = vmatmul.msk.f32.gmra.mxu1 %vm313_vm1, %v273_v58 }
 0x1b5   : > { %v516_v59 = vpop.f32.mrf.mxu2  ;;  %v629_v60 = vpop.f32.mrf.mxu3 }
 0x1b6   : > { %697 = vst [vmem:[%s1294_s27 + $0x1c0] sm:$0xff] %v516_v59 }
 0x1b7   : > { %698 = vst [vmem:[%s1294_s27 + $0x1c8] sm:$0xff] %v629_v60 }
 0x1b9   : > { %v274_v61 = vpop.trf.xlu0 }
 0x1ba   : > { %872 = vmatmul.msk.f32.gmra.mxu0 %vm313_vm1, %v274_v61  ;;  %905 = vmatmul.msk.f32.gmra.mxu1 %vm313_vm1, %v274_v61 }
 0x1bd   : > { %v519_v62 = vpop.f32.mrf.mxu2  ;;  %v632_v63 = vpop.f32.mrf.mxu3 }
 0x1be   : > { %699 = vst [vmem:[%s1294_s27 + $0x1d0] sm:$0xff] %v519_v62 }
 0x1bf   : > { %700 = vst [vmem:[%s1294_s27 + $0x1d8] sm:$0xff] %v632_v63 }
 0x1c1   : > { %v275_v0 = vpop.trf.xlu0 }
 0x1c2   : > { %873 = vmatmul.msk.f32.gmra.mxu0 %vm313_vm1, %v275_v0  ;;  %906 = vmatmul.msk.f32.gmra.mxu1 %vm313_vm1, %v275_v0 }
 0x1c5   : > { %v522_v1 = vpop.f32.mrf.mxu2  ;;  %v635_v2 = vpop.f32.mrf.mxu3 }
 0x1c6   : > { %701 = vst [vmem:[%s1294_s27 + $0x1e0] sm:$0xff] %v522_v1 }
 0x1c7   : > { %702 = vst [vmem:[%s1294_s27 + $0x1e8] sm:$0xff] %v635_v2 }
 0x1c9   : > { %v276_v3 = vpop.trf.xlu0 }
 0x1ca   : > { %874 = vmatmul.msk.f32.gmra.mxu0 %vm313_vm1, %v276_v3  ;;  %907 = vmatmul.msk.f32.gmra.mxu1 %vm313_vm1, %v276_v3 }
 0x1cd   : > { %v525_v4 = vpop.f32.mrf.mxu2  ;;  %v638_v5 = vpop.f32.mrf.mxu3 }
 0x1ce   : > { %703 = vst [vmem:[%s1294_s27 + $0x1f0] sm:$0xff] %v525_v4 }
 0x1cf   : > { %704 = vst [vmem:[%s1294_s27 + $0x1f8] sm:$0xff] %v638_v5  ;;  %v432_v6 = vpop.f32.mrf.mxu0  ;;  %v545_v7 = vpop.f32.mrf.mxu1 }
 0x1d0   : > { %641 = vst [vmem:[%s1294_s27] sm:$0xff] %v432_v6 }
 0x1d1   : > { %642 = vst [vmem:[%s1294_s27 + $0x8] sm:$0xff] %v545_v7 }
 0x1d7   : > { %v435_v8 = vpop.f32.mrf.mxu0  ;;  %v548_v9 = vpop.f32.mrf.mxu1 }
 0x1d8   : > { %643 = vst [vmem:[%s1294_s27 + $0x10] sm:$0xff] %v435_v8 }
 0x1d9   : > { %644 = vst [vmem:[%s1294_s27 + $0x18] sm:$0xff] %v548_v9 }
 0x1df   : > { %v438_v10 = vpop.f32.mrf.mxu0  ;;  %v551_v11 = vpop.f32.mrf.mxu1 }
 0x1e0   : > { %645 = vst [vmem:[%s1294_s27 + $0x20] sm:$0xff] %v438_v10 }
 0x1e1   : > { %646 = vst [vmem:[%s1294_s27 + $0x28] sm:$0xff] %v551_v11 }
 0x1e7   : > { %v441_v12 = vpop.f32.mrf.mxu0  ;;  %v554_v13 = vpop.f32.mrf.mxu1 }
 0x1e8   : > { %647 = vst [vmem:[%s1294_s27 + $0x30] sm:$0xff] %v441_v12 }
 0x1e9   : > { %648 = vst [vmem:[%s1294_s27 + $0x38] sm:$0xff] %v554_v13 }
 0x1ef   : > { %v444_v14 = vpop.f32.mrf.mxu0  ;;  %v557_v15 = vpop.f32.mrf.mxu1 }
 0x1f0   : > { %649 = vst [vmem:[%s1294_s27 + $0x40] sm:$0xff] %v444_v14 }
 0x1f1   : > { %650 = vst [vmem:[%s1294_s27 + $0x48] sm:$0xff] %v557_v15 }
 0x1f7   : > { %v447_v16 = vpop.f32.mrf.mxu0  ;;  %v560_v17 = vpop.f32.mrf.mxu1 }
 0x1f8   : > { %651 = vst [vmem:[%s1294_s27 + $0x50] sm:$0xff] %v447_v16 }
 0x1f9   : > { %652 = vst [vmem:[%s1294_s27 + $0x58] sm:$0xff] %v560_v17 }
 0x1ff   : > { %v450_v18 = vpop.f32.mrf.mxu0  ;;  %v563_v19 = vpop.f32.mrf.mxu1 }
 0x200   : > { %653 = vst [vmem:[%s1294_s27 + $0x60] sm:$0xff] %v450_v18 }
 0x201   : > { %654 = vst [vmem:[%s1294_s27 + $0x68] sm:$0xff] %v563_v19 }
 0x207   : > { %v453_v20 = vpop.f32.mrf.mxu0  ;;  %v566_v21 = vpop.f32.mrf.mxu1 }
 0x208   : > { %655 = vst [vmem:[%s1294_s27 + $0x70] sm:$0xff] %v453_v20 }
 0x209   : > { %656 = vst [vmem:[%s1294_s27 + $0x78] sm:$0xff] %v566_v21 }
 0x20f   : > { %v456_v22 = vpop.f32.mrf.mxu0  ;;  %v569_v23 = vpop.f32.mrf.mxu1 }
 0x210   : > { %657 = vst [vmem:[%s1294_s27 + $0x80] sm:$0xff] %v456_v22 }
 0x211   : > { %658 = vst [vmem:[%s1294_s27 + $0x88] sm:$0xff] %v569_v23 }
 0x217   : > { %v459_v24 = vpop.f32.mrf.mxu0  ;;  %v572_v25 = vpop.f32.mrf.mxu1 }
 0x218   : > { %659 = vst [vmem:[%s1294_s27 + $0x90] sm:$0xff] %v459_v24 }
 0x219   : > { %660 = vst [vmem:[%s1294_s27 + $0x98] sm:$0xff] %v572_v25 }
 0x21f   : > { %v462_v26 = vpop.f32.mrf.mxu0  ;;  %v575_v27 = vpop.f32.mrf.mxu1 }
 0x220   : > { %661 = vst [vmem:[%s1294_s27 + $0xa0] sm:$0xff] %v462_v26 }
 0x221   : > { %662 = vst [vmem:[%s1294_s27 + $0xa8] sm:$0xff] %v575_v27 }
 0x227   : > { %v465_v28 = vpop.f32.mrf.mxu0  ;;  %v578_v29 = vpop.f32.mrf.mxu1 }
 0x228   : > { %663 = vst [vmem:[%s1294_s27 + $0xb0] sm:$0xff] %v465_v28 }
 0x229   : > { %664 = vst [vmem:[%s1294_s27 + $0xb8] sm:$0xff] %v578_v29 }
 0x22f   : > { %v468_v30 = vpop.f32.mrf.mxu0  ;;  %v581_v31 = vpop.f32.mrf.mxu1 }
 0x230   : > { %665 = vst [vmem:[%s1294_s27 + $0xc0] sm:$0xff] %v468_v30 }
 0x231   : > { %666 = vst [vmem:[%s1294_s27 + $0xc8] sm:$0xff] %v581_v31 }
 0x237   : > { %v471_v32 = vpop.f32.mrf.mxu0  ;;  %v584_v33 = vpop.f32.mrf.mxu1 }
 0x238   : > { %667 = vst [vmem:[%s1294_s27 + $0xd0] sm:$0xff] %v471_v32 }
 0x239   : > { %668 = vst [vmem:[%s1294_s27 + $0xd8] sm:$0xff] %v584_v33 }
 0x23f   : > { %v474_v34 = vpop.f32.mrf.mxu0  ;;  %v587_v35 = vpop.f32.mrf.mxu1 }
 0x240   : > { %669 = vst [vmem:[%s1294_s27 + $0xe0] sm:$0xff] %v474_v34 }
 0x241   : > { %670 = vst [vmem:[%s1294_s27 + $0xe8] sm:$0xff] %v587_v35 }
 0x247   : > { %v477_v36 = vpop.f32.mrf.mxu0  ;;  %v590_v37 = vpop.f32.mrf.mxu1 }
 0x248   : > { %671 = vst [vmem:[%s1294_s27 + $0xf0] sm:$0xff] %v477_v36 }
 0x249   : > { %672 = vst [vmem:[%s1294_s27 + $0xf8] sm:$0xff] %v590_v37 }
 0x24a   : > { %1091 = shalt.err (!%p1088_p13)
}
 0x24b   : > { %s1152_s19 = smov 256   ;;  %s1153_s26 = smov 16  }
 0x24c   : > { %938 = dma.vmem_to_hbm [thread:$0]  (%p1220_p9), %s724_s8, 8192, %s726_s15, %s706_s16, %s1152_s19, %s1152_s19, %s1153_s26  }
 0x24d PF: > { %s740_s25 = sand.u32 1, %s1130_s9   ;;  %p948_p0 = pnand %p847_p12, %p1227_p11 }
 0x24e   : > { %s741_s21 = scalar_lea.sflag [#allocation4], %s740_s25 }
 0x24f   : > { %p949_p1 = pneg %p948_p0 }
 0x251   : > { %1125 = dma.done.wait (%p949_p1), %s741_s21, 8192  }
 0x252   : > { %1127 = vsyncadd (%p949_p1), %s741_s21, 4294959104  ;;  %s21_s14 = sadd.s32 1, %s1150_s14   ;;  %s1436_s9 = smov %s1134_s10 }
 0x253   : > { %p18_p2 = scmp.ge.s32.totalorder %s21_s14, 4   ;;  %s1437_s10 = smov %s1138_s11 }
 0x254   : > { %s1438_s11 = smov %s1225_s23  ;;  %s1439_s12 = smov %s1146_s13 }
 0x255   : > { %s1440_s13 = smov %s1442_s17  ;;  %20 = sbr.rel (!%p18_p2) target bundleno = 8 (0x8), region = 86 }
 0x25a   :  { %747 = vsyncpa [#allocation3], 1 }
 0x25b   :  { %749 = vsyncpa [#allocation3 + $0x1], 1 }
 0x25c   :  { %750 = vsyncpa [#allocation6], 1 }
 0x25d   :  { %752 = vsyncpa [#allocation6 + $0x1], 1 }
 0x25e   :  { %753 = vsyncpa [#allocation4], 1 }
 0x25f   :  { %755 = vsyncpa [#allocation4 + $0x1], 1 }

</bundles_post_ra>
